<compile_context>
chip_gen: v7x
topology: tpu7x:2x2x1
jax: 0.10.0
libtpu: 0.0.40
codegen_flags: <defaults>
</compile_context>

<pallas_src>
import jax
import jax.numpy as jnp
from jax.experimental import pallas as pl
from jax.experimental.pallas import tpu as pltpu


def _norm_linear_kernel(x_ref, wt_ref, b_ref, o_ref, xn_ref):
    """Produce one (tb, tn) output tile.

    x_ref : (tb, E)  raw input rows (block constant over the j axis)
    wt_ref: (E, tn)  W^T column block, already in the MXU dtype
    b_ref : (1, tn)  bias slice (f32)
    xn_ref: (tb, E)  VMEM scratch caching the normalized rows (MXU dtype)
    """
    # Normalization depends only on the batch tile -> compute once per i
    # (at j == 0) and reuse across all output-column tiles (j is sequential).
    @pl.when(pl.program_id(1) == 0)
    def _():
        x = x_ref[...].astype(jnp.float32)                    # norm math in f32
        sq = jnp.sum(x * x, axis=-1, keepdims=True)           # (tb, 1)
        # 1 / max(||x||, 1e-12) == rsqrt(max(||x||^2, 1e-24)) -> one EUP op.
        inv = jax.lax.rsqrt(jnp.maximum(sq, 1e-24))
        xn_ref[...] = (x * inv).astype(xn_ref.dtype)

    y = jnp.dot(xn_ref[...], wt_ref[...], preferred_element_type=jnp.float32)
    y = y + b_ref[...]                                         # bias add in f32
    o_ref[...] = y.astype(o_ref.dtype)


def _is_v5e():
    try:
        kind = jax.devices()[0].device_kind.lower()
    except Exception:
        return False
    return ("v5 lite" in kind) or ("v5e" in kind) or ("v5litepod" in kind)


def _pick_tn(E, cap):
    """Largest 128-multiple divisor of E that is <= cap; full E if none/small."""
    if E <= 1024:
        return E
    start = max(128, (cap // 128) * 128)
    for cand in range(start, 0, -128):
        if E % cand == 0:
            return cand
    return E  # E not a multiple of 128 -> keep the full (untiled) width


def prepare_params(weight, bias, matmul_dtype=jnp.bfloat16):
    """One-time param prep: W -> W^T in (in, out) layout, cast to MXU dtype.

    Do this once (outside the per-step path) so the E^2 transpose/cast HBM
    round-trip is not paid on every forward call.
    """
    wt = jnp.asarray(weight).T.astype(matmul_dtype)            # (in=E, out=E)
    b2 = jnp.asarray(bias).reshape(1, -1).astype(jnp.float32)  # (1, E)
    return wt, b2


def neural_network_forward_prepared(x, wt, b2, *, tb=None, tn=None,
                                    out_dtype=None, use_pallas=None):
    """x: (B, E); wt: (E, E) pre-transposed W^T in MXU dtype; b2: (1, E) f32."""
    B, E = x.shape
    assert wt.shape == (E, E) and b2.shape == (1, E)
    matmul_dtype = wt.dtype
    out_dtype = x.dtype if out_dtype is None else out_dtype

    # Tiny problems: a 1x1-grid Pallas call is pure launch/pipeline overhead,
    # so default to fused XLA there (kernel can still be forced).
    if use_pallas is None:
        use_pallas = (B * E) >= (128 * 1024)
    if not use_pallas:
        xf = x.astype(jnp.float32)
        inv = jax.lax.rsqrt(
            jnp.maximum(jnp.sum(xf * xf, axis=-1, keepdims=True), 1e-24))
        xn = (xf * inv).astype(matmul_dtype)
        y = jnp.dot(xn, wt, preferred_element_type=jnp.float32) + b2
        return y.astype(out_dtype)

    # ---- batch tile: fill the MXU height, generation aware -------------------
    if tb is None:
        cap = 128 if _is_v5e() else 512     # v5e MXU is 128 tall / VMEM-starved
        tb = B if B <= cap else cap
    nb = pl.cdiv(B, tb)
    Bp = nb * tb
    if Bp != B:
        # Zero rows keep ||row|| = 0 -> xn stays 0 (no NaN); sliced off below.
        # TODO(synk): mask the last batch tile instead of padding to avoid the
        # extra B x E HBM copy for ragged B.
        x = jnp.pad(x, ((0, Bp - B), (0, 0)))

    # ---- output-column tile: full E when small, else a 128-multiple divisor --
    if tn is None:
        tn_cap = 512 if jnp.dtype(matmul_dtype).itemsize <= 2 else 256
        tn = _pick_tn(E, tn_cap)
    assert E % tn == 0, "tn must divide E"
    nj = E // tn

    # Constant-index operands (whole weight / bias resident) need only one
    # VMEM buffer; with nj > 1 keep default double-buffering for streaming.
    if nj == 1:
        wt_spec = pl.BlockSpec((E, tn), lambda i, j: (0, j),
                               pipeline_mode=pl.Buffered(1))
        b_spec = pl.BlockSpec((1, tn), lambda i, j: (0, j),
                              pipeline_mode=pl.Buffered(1))
    else:
        wt_spec = pl.BlockSpec((E, tn), lambda i, j: (0, j))
        b_spec = pl.BlockSpec((1, tn), lambda i, j: (0, j))

    # VMEM budget for the chosen tiles (double buffers + scratch) so the
    # 16/32 MiB default scoped limits never force tiny tiles or a failure.
    itm = jnp.dtype(matmul_dtype).itemsize
    est = (2 * tb * E * x.dtype.itemsize                     # x double buffer
           + (1 if nj == 1 else 2) * E * tn * itm            # W^T block(s)
           + 2 * tn * 4                                      # bias
           + 2 * tb * tn * jnp.dtype(out_dtype).itemsize     # output
           + tb * E * itm)                                   # xn scratch
    vmem_limit = int(min(max(est * 5 // 4, 32 << 20), 100 << 20))

    out = pl.pallas_call(
        _norm_linear_kernel,
        out_shape=jax.ShapeDtypeStruct((Bp, E), out_dtype),
        grid_spec=pltpu.PrefetchScalarGridSpec(
            num_scalar_prefetch=0,
            grid=(nb, nj),
            in_specs=[
                pl.BlockSpec((tb, E), lambda i, j: (i, 0)),   # x (const over j)
                wt_spec,                                      # W^T column block
                b_spec,                                       # bias slice
            ],
            out_specs=pl.BlockSpec((tb, tn), lambda i, j: (i, j)),
            scratch_shapes=[pltpu.VMEM((tb, E), matmul_dtype)],
        ),
        compiler_params=pltpu.CompilerParams(
            # i parallel (megacore shards batch), j sequential so the cached
            # normalized tile is valid across output-column blocks.
            dimension_semantics=("parallel", "arbitrary"),
            vmem_limit_bytes=vmem_limit),
    )(x, wt, b2)

    return out[:B] if Bp != B else out


def neural_network_forward(x, weight, bias, *, matmul_dtype=jnp.bfloat16, **kw):
    """Convenience wrapper (prefer prepare_params once + *_prepared per step)."""
    wt, b2 = prepare_params(weight, bias, matmul_dtype=matmul_dtype)
    return neural_network_forward_prepared(x, wt, b2, **kw)


if __name__ == "__main__":
    key = jax.random.PRNGKey(0)
    kx, kb, kx2 = jax.random.split(key, 3)

    # ---- case 1: module-like small shape (single grid step) -----------------
    B, E = 16, 128
    x = jax.random.normal(kx, (B, E), dtype=jnp.float32)
    # Parameters matching the module's __init__:
    #   linear.weight = eye(E)  (torch.nn.init.eye_)
    #   linear.bias   = U(-1/sqrt(E), 1/sqrt(E))  (PyTorch default Linear init)
    weight = jnp.eye(E, dtype=jnp.float32)
    bound = 1.0 / jnp.sqrt(jnp.float32(E))
    bias = jax.random.uniform(kb, (E,), minval=-bound, maxval=bound,
                              dtype=jnp.float32)

    # Pure-JAX reference (F.normalize semantics: eps=1e-12 on the norm).
    norm = jnp.maximum(jnp.sqrt(jnp.sum(x * x, axis=1, keepdims=True)), 1e-12)
    ref = (x / norm) @ weight.T + bias

    # Exact-precision path (f32 MXU) — tight tolerance.
    wt32, b32 = prepare_params(weight, bias, matmul_dtype=jnp.float32)
    out_f32 = jax.block_until_ready(
        neural_network_forward_prepared(x, wt32, b32, use_pallas=True))
    assert jnp.allclose(out_f32, ref, atol=1e-5, rtol=1e-5)

    # Default fast path: bf16 W^T prepared once, f32 accumulation.
    wtb, bb = prepare_params(weight, bias)
    out_bf16 = jax.block_until_ready(
        neural_network_forward_prepared(x, wtb, bb, use_pallas=True))
    assert jnp.allclose(out_bf16, ref, atol=5e-3, rtol=5e-3)

    # ---- case 2: exercise nj > 1 (norm-cache across j) + ragged batch pad ---
    B2, E2 = 20, 256
    x2 = jax.random.normal(kx2, (B2, E2), dtype=jnp.float32)
    w2 = jnp.eye(E2, dtype=jnp.float32)
    b2v = jax.random.uniform(kb, (E2,), minval=-0.0625, maxval=0.0625,
                             dtype=jnp.float32)
    norm2 = jnp.maximum(jnp.sqrt(jnp.sum(x2 * x2, axis=1, keepdims=True)), 1e-12)
    ref2 = (x2 / norm2) @ w2.T + b2v
    wt2, bb2 = prepare_params(w2, b2v)
    out2 = jax.block_until_ready(
        neural_network_forward_prepared(x2, wt2, bb2, tb=8, tn=128,
                                        use_pallas=True))
    assert jnp.allclose(out2, ref2, atol=5e-3, rtol=5e-3)

    print("KERNEL_OK")
</pallas_src>

<mosaic_0001>
module attributes {stable_mosaic.version = 11 : i64} {
  func.func @_norm_linear_kernel(%arg0: i32, %arg1: i32, %arg2: memref<16x128xf32, #tpu.memory_space<vmem>>, %arg3: memref<128x128xf32, #tpu.memory_space<vmem>>, %arg4: memref<1x128xf32, #tpu.memory_space<vmem>>, %arg5: memref<16x128xf32, #tpu.memory_space<vmem>>, %arg6: memref<16x128xf32, #tpu.memory_space<vmem>>) attributes {dimension_semantics = [#tpu.dimension_semantics<parallel>, #tpu.dimension_semantics<arbitrary>], iteration_bounds = array<i64: 1, 1>, scalar_prefetch = 0 : i64, scratch_operands = 1 : i64, tpu.core_type = #tpu.core_type<tc>, window_params = [{transform_indices = @transform_0, window_bounds = array<i64: 16, 128>}, {pipeline_mode = #tpu.pipeline_mode<synchronous>, transform_indices = @transform_1, window_bounds = array<i64: 128, 128>}, {pipeline_mode = #tpu.pipeline_mode<synchronous>, transform_indices = @transform_2, window_bounds = array<i64: 1, 128>}, {transform_indices = @transform_3, window_bounds = array<i64: 16, 128>}]} {
    %c0_i32 = arith.constant 0 : i32
    %0 = arith.cmpi eq, %arg1, %c0_i32 : i32
    %1 = arith.extui %0 : i1 to i32
    %c0_i32_0 = arith.constant 0 : i32
    %2 = arith.cmpi ne, %1, %c0_i32_0 : i32
    scf.if %2 {
      %c0_8 = arith.constant 0 : index
      %c0_9 = arith.constant 0 : index
      %10 = vector.load %arg2[%c0_8, %c0_9] : memref<16x128xf32, #tpu.memory_space<vmem>>, vector<16x128xf32>
      %11 = arith.mulf %10, %10 : vector<16x128xf32>
      %cst_10 = arith.constant dense<0.000000e+00> : vector<16xf32>
      %12 = vector.multi_reduction <add>, %11, %cst_10 [1] : vector<16x128xf32> to vector<16xf32>
      %13 = vector.shape_cast %12 : vector<16xf32> to vector<16x1xf32>
      %cst_11 = arith.constant 1.000000e-24 : f32
      %14 = vector.broadcast %cst_11 : f32 to vector<16x1xf32>
      %15 = arith.maximumf %13, %14 : vector<16x1xf32>
      %16 = math.rsqrt %15 : vector<16x1xf32>
      %17 = vector.broadcast %16 : vector<16x1xf32> to vector<16x128xf32>
      %18 = arith.mulf %10, %17 : vector<16x128xf32>
      %c0_12 = arith.constant 0 : index
      %c0_13 = arith.constant 0 : index
      %19 = vector.load %arg6[%c0_12, %c0_13] : memref<16x128xf32, #tpu.memory_space<vmem>>, vector<16x128xf32>
      tpu.vector_store %arg6[%c0_12, %c0_13], %18 {strides = array<i32>} : memref<16x128xf32, #tpu.memory_space<vmem>>, vector<16x128xf32>,
    } else {
    }
    %c0 = arith.constant 0 : index
    %c0_1 = arith.constant 0 : index
    %3 = vector.load %arg6[%c0, %c0_1] : memref<16x128xf32, #tpu.memory_space<vmem>>, vector<16x128xf32>
    %c0_2 = arith.constant 0 : index
    %c0_3 = arith.constant 0 : index
    %4 = vector.load %arg3[%c0_2, %c0_3] : memref<128x128xf32, #tpu.memory_space<vmem>>, vector<128x128xf32>
    %cst = arith.constant dense<0.000000e+00> : vector<16x128xf32>
    %5 = tpu.matmul %3, %4, %cst {dimension_numbers = #tpu.dot_dimension_numbers<[1], [0], [0], [1], [0, 0, 1, 1], [], []>} : vector<16x128xf32>, vector<128x128xf32>, vector<16x128xf32> -> vector<16x128xf32>
    %c0_4 = arith.constant 0 : index
    %c0_5 = arith.constant 0 : index
    %6 = vector.load %arg4[%c0_4, %c0_5] : memref<1x128xf32, #tpu.memory_space<vmem>>, vector<1x128xf32>
    %7 = vector.broadcast %6 : vector<1x128xf32> to vector<16x128xf32>
    %8 = arith.addf %5, %7 : vector<16x128xf32>
    %c0_6 = arith.constant 0 : index
    %c0_7 = arith.constant 0 : index
    %9 = vector.load %arg5[%c0_6, %c0_7] : memref<16x128xf32, #tpu.memory_space<vmem>>, vector<16x128xf32>
    tpu.vector_store %arg5[%c0_6, %c0_7], %8 {strides = array<i32>} : memref<16x128xf32, #tpu.memory_space<vmem>>, vector<16x128xf32>,
    return
  }
  func.func @transform_0(%arg0: i32, %arg1: i32) -> (i32, i32) {
    %c0_i32 = arith.constant 0 : i32
    %c0_i32_0 = arith.constant 0 : i32
    return %arg0, %c0_i32 : i32, i32
  }
  func.func @transform_1(%arg0: i32, %arg1: i32) -> (i32, i32) {
    %c0_i32 = arith.constant 0 : i32
    %c0_i32_0 = arith.constant 0 : i32
    return %c0_i32, %arg1 : i32, i32
  }
  func.func @transform_2(%arg0: i32, %arg1: i32) -> (i32, i32) {
    %c0_i32 = arith.constant 0 : i32
    %c0_i32_0 = arith.constant 0 : i32
    return %c0_i32, %arg1 : i32, i32
  }
  func.func @transform_3(%arg0: i32, %arg1: i32) -> (i32, i32) {
    %c0_i32 = arith.constant 0 : i32
    return %arg0, %arg1 : i32, i32
  }
}

</mosaic_0001>

<bundles_post_ra>
// kernel: tpu_custom_call.1
= control target key start
LH: loop header
LB: loop body
LE: loop exit
PB: predicated region body
PF: predicated region fallthrough
CT: control target
= control target key end

     0   :  { %8 = vsyncpa [#allocation4], 0  ;;  %s423_s0 = inlined_call_operand.hbm [shape: f32[16,128], index: 0, kind: input, shape index: {}]   ;;  %s424_s1 = inlined_call_operand.hbm [shape: f32[128,128], index: 1, kind: input, shape index: {}]   ;;  %s425_s2 = inlined_call_operand.vmem [shape: f32[1,128], index: 2, kind: input, shape index: {}]   ;;  %s426_s3 = inlined_call_operand.hbm [shape: f32[16,128], index: 3, kind: output, shape index: {}]  }
   0x1   :  { %9 = vsyncpa [#allocation7], 0 }
   0x2   :  { %10 = vsyncpa [#allocation5], 0  ;;  %s350_s12 = smov [#allocation3]   ;;  %s278_s16 = scalar_lea.hbm %s423_s0, 256 }
   0x3   :  { %s16_s13 = sshll.u32 %s350_s12, 4  ;;  %p279_p0 = scmp.ne.s32.totalorder %s423_s0, %s278_s16  ;;  %s17_s13 = int_to_ptr.vmem [resolvable:$true] %s16_s13 }
   0x4   :  { %p282_p1 = scmp.lt.u32.totalorder %s278_s16, %s423_s0 }
   0x6   :  { %p284_p2 = pnand %p282_p1, %p279_p0 }
   0x8   :  { %287 = shalt.err (!%p284_p2)
}
   0x9   :  { %s288_s21 = scalar_lea.vmem %s17_s13, 256  ;;  %p293_p4 = scmp.lt.s32.totalorder %s17_s13, %s17_s13 }
   0xa   :  { %p289_p3 = scmp.ne.s32.totalorder %s17_s13, %s288_s21  ;;  %p294_p5 = scmp.lt.s32.totalorder %s288_s21, %s288_s21 }
   0xc   :  { %p295_p6 = por %p294_p5, %p293_p4 }
   0xe   :  { %p296_p7 = pnand %p295_p6, %p289_p3 }
  0x10   :  { %299 = shalt.err (!%p296_p7)
}
  0x11   :  { %s351_s22 = smov 128   ;;  %s352_s23 = smov 8  }
  0x12   :  { %22 = dma.hbm_to_vmem [thread:$0]  %s423_s0, 256, %s17_s13, [#allocation4], %s351_s22, %s351_s22, %s352_s23  }
  0x13   :  { %s353_s26 = smov [#allocation6]   ;;  %s300_s30 = scalar_lea.hbm %s424_s1, 2048 }
  0x14   :  { %s28_s27 = sshll.u32 %s353_s26, 4  ;;  %p301_p8 = scmp.ne.s32.totalorder %s424_s1, %s300_s30  ;;  %s29_s27 = int_to_ptr.vmem [resolvable:$true] %s28_s27 }
  0x15   :  { %p304_p9 = scmp.lt.u32.totalorder %s300_s30, %s424_s1 }
  0x17   :  { %p306_p10 = pnand %p304_p9, %p301_p8 }
  0x19   :  { %309 = shalt.err (!%p306_p10)
}
  0x1a   :  { %s310_s8 = scalar_lea.vmem %s29_s27, 2048  ;;  %p315_p12 = scmp.lt.s32.totalorder %s29_s27, %s29_s27 }
  0x1b   :  { %p311_p11 = scmp.ne.s32.totalorder %s29_s27, %s310_s8  ;;  %p316_p13 = scmp.lt.s32.totalorder %s310_s8, %s310_s8 }
  0x1d   :  { %p317_p0 = por %p316_p13, %p315_p12 }
  0x1f   :  { %p318_p1 = pnand %p317_p0, %p311_p11 }
  0x21   :  { %321 = shalt.err (!%p318_p1)
}
  0x22   :  { %34 = dma.hbm_to_vmem [thread:$0]  %s424_s1, 2048, %s29_s27, [#allocation7], %s351_s22, %s351_s22, %s352_s23  }
  0x23   :  { %344 = dma.done.wait [#allocation4], 256  }
  0x24   :  { %345 = vsyncadd [#allocation4], 4294967040 }
  0x25   :  { %346 = dma.done.wait [#allocation7], 2048  }
  0x26   :  { %347 = vsyncadd [#allocation7], 4294965248  ;;  %v47_v0 = vld [vmem:[#allocation3] sm:$0xff]  ;;  %v48_v1 = vld [vmem:[#allocation3 + $0x8] sm:$0xff]  ;;  %s354_s11 = smov [#allocation8]  }
  0x27   :  { %v65_v2 = vld [vmem:[#allocation6] sm:$0xff]  ;;  %v49_v3 = vmul.f32 %v47_v0, %v47_v0  ;;  %v66_v4 = vld [vmem:[#allocation6 + $0x8] sm:$0xff]  ;;  %v67_v5 = vld [vmem:[#allocation6 + $0x10] sm:$0xff]  ;;  %v50_v9 = vmul.f32 %v48_v1, %v48_v1  ;;  %s170_s12 = sshll.u32 %s354_s11, 4  ;;  %s171_s12 = int_to_ptr.vmem [resolvable:$true] %s170_s12 }
  0x28   :  { %v68_v6 = vld [vmem:[#allocation6 + $0x18] sm:$0xff]  ;;  %v237_v7 = vpack.c.bf16 %v66_v4, %v65_v2  ;;  %v69_v10 = vld [vmem:[#allocation6 + $0x20] sm:$0xff]  ;;  %v70_v11 = vld [vmem:[#allocation6 + $0x28] sm:$0xff]  ;;  %s322_s13 = scalar_lea.vmem %s171_s12, 256  ;;  %p327_p3 = scmp.lt.s32.totalorder %s171_s12, %s171_s12 }
  0x29   :  { %v241_v8 = vpack.c.bf16 %v68_v6, %v67_v5  ;;  %51 = vadd.xlane.f32.xlu0 %v49_v3  ;;  %v245_v12 = vpack.c.bf16 %v70_v11, %v69_v10  ;;  %v71_v13 = vld [vmem:[#allocation6 + $0x30] sm:$0xff]  ;;  %v72_v14 = vld [vmem:[#allocation6 + $0x38] sm:$0xff]  ;;  %v73_v16 = vld [vmem:[#allocation6 + $0x40] sm:$0xff]  ;;  %p323_p2 = scmp.ne.s32.totalorder %s171_s12, %s322_s13  ;;  %p328_p4 = scmp.lt.s32.totalorder %s322_s13, %s322_s13 }
  0x2a   :  { %238 = vmatprep.subr.bf16.mxu0 %v237_v7  ;;  %v249_v15 = vpack.c.bf16 %v72_v14, %v71_v13  ;;  %v74_v17 = vld [vmem:[#allocation6 + $0x48] sm:$0xff]  ;;  %v75_v19 = vld [vmem:[#allocation6 + $0x50] sm:$0xff]  ;;  %v76_v20 = vld [vmem:[#allocation6 + $0x58] sm:$0xff] }
  0x2b   :  { %240 = vmatpush3.bf16.msra.mxu0 %v237_v7  ;;  %v253_v18 = vpack.c.bf16 %v74_v17, %v73_v16  ;;  %v257_v21 = vpack.c.bf16 %v76_v20, %v75_v19  ;;  %v77_v22 = vld [vmem:[#allocation6 + $0x60] sm:$0xff]  ;;  %v78_v23 = vld [vmem:[#allocation6 + $0x68] sm:$0xff]  ;;  %v79_v24 = vld [vmem:[#allocation6 + $0x70] sm:$0xff]  ;;  %p329_p5 = por %p328_p4, %p327_p3 }
  0x2c   :  { %242 = vmatprep.subr.bf16.mxu0 %v241_v8  ;;  %v261_v25 = vpack.c.bf16 %v78_v23, %v77_v22  ;;  %v80_v26 = vld [vmem:[#allocation6 + $0x78] sm:$0xff]  ;;  %v183_v36 = vld [vmem:[%s425_s2] ss:$0 sm:$0xff] }
  0x2d   :  { %53 = vadd.xlane.f32.xlu0 %v50_v9  ;;  %v265_v27 = vpack.c.bf16 %v80_v26, %v79_v24  ;;  %p330_p6 = pnand %p329_p5, %p323_p2 }
  0x2f   :  { %244 = vmatpush3.bf16.msra.mxu0 %v241_v8 }
  0x30   :  { %246 = vmatprep.subr.bf16.mxu0 %v245_v12 }
  0x33   :  { %248 = vmatpush3.bf16.msra.mxu0 %v245_v12 }
  0x34   :  { %250 = vmatprep.subr.bf16.mxu0 %v249_v15 }
  0x37   :  { %252 = vmatpush3.bf16.msra.mxu0 %v249_v15 }
  0x38   :  { %254 = vmatprep.subr.bf16.mxu0 %v253_v18 }
  0x3b   :  { %256 = vmatpush3.bf16.msra.mxu0 %v253_v18 }
  0x3c   :  { %258 = vmatprep.subr.bf16.mxu0 %v257_v21 }
  0x3f   :  { %260 = vmatpush3.bf16.msra.mxu0 %v257_v21 }
  0x40   :  { %262 = vmatprep.subr.bf16.mxu0 %v261_v25 }
  0x43   :  { %264 = vmatpush3.bf16.msra.mxu0 %v261_v25 }
  0x44   :  { %266 = vmatprep.subr.bf16.mxu0 %v265_v27 }
  0x47   :  { %268 = vmatpush3.bf16.msra.mxu0 %v265_v27 }
  0xb6   :  { %v52_v28 = vpop.xlane.xlu0 %51 }
  0xb7   :  { %v55_v29 = vmax.f32 %v52_v28, 1e-24 }
  0xb9   :  { %274 = vrsqrt.f32 %v55_v29 }
  0xba   :  { %v54_v30 = vpop.xlane.xlu0 %53 }
  0xbb   :  { %v56_v31 = vmax.f32 %v54_v30, 1e-24 }
  0xbd   :  { %276 = vrsqrt.f32 %v56_v31 }
  0xc3   :  { %v275_v32 = vpop.eup %274 }
  0xc4   :  { %v59_v33 = vmul.f32 %v275_v32, %v47_v0 }
  0xc6   :  { %234 = vmatprep.mubr.f32.mxu0 %v59_v33 }
  0xc7   :  { %v277_v34 = vpop.eup %276 }
  0xc8   :  { %v60_v35 = vmul.f32 %v277_v34, %v48_v1 }
  0xca   :  { %235 = vmatmul.mubr.f32.vlgmr.msra.gmra.mrb[0].mxu0 %v60_v35 }
 0x19d   :  { %v236_v37 = vpop.f32.mrb[0].mxu0 }
 0x19e   :  { %v160_v38 = vadd.f32 %v236_v37, %v183_v36  ;;  %v154_v39 = vpop.f32.mrb[1].mxu0 }
 0x19f   :  { %v155_v40 = vadd.f32 %v183_v36, %v154_v39 }
 0x1a0   :  { %164 = vst [vmem:[#allocation8 + $0x8] sm:$0xff] %v160_v38 }
 0x1a1   :  { %163 = vst [vmem:[#allocation8] sm:$0xff] %v155_v40 }
 0x1a2   :  { %333 = shalt.err (!%p330_p6)
}
 0x1a3   :  { %s334_s2 = scalar_lea.hbm %s426_s3, 256 }
 0x1a4   :  { %p335_p7 = scmp.ne.s32.totalorder %s426_s3, %s334_s2  ;;  %p338_p8 = scmp.lt.u32.totalorder %s334_s2, %s426_s3 }
 0x1a6   :  { %p340_p9 = pnand %p338_p8, %p335_p7 }
 0x1a8   :  { %343 = shalt.err (!%p340_p9)
}
 0x1a9   :  { %176 = dma.vmem_to_hbm [thread:$0]  %s171_s12, 256, %s426_s3, [#allocation5], %s351_s22, %s351_s22, %s352_s23  }
 0x1aa   :  { %348 = dma.done.wait [#allocation5], 256  }
 0x1ab   :  { %349 = vsyncadd [#allocation5], 4294967040 }
 0x1ac   :  { %180 = vsyncpa [#allocation4], 1 }
 0x1ad   :  { %181 = vsyncpa [#allocation7], 1 }
 0x1ae   :  { %182 = vsyncpa [#allocation5], 1 }

</bundles_post_ra>
